<compile_context>
chip_gen: v6e
topology: v6e:2x2x1
jax: 0.10.0
libtpu: 0.0.40
codegen_flags: <defaults>
</compile_context>

<pallas_src>
import functools
import math

import jax
import jax.numpy as jnp
from jax.experimental import pallas as pl
from jax.experimental.pallas import tpu as pltpu


_VMEM_LIMIT = 48 * 1024 * 1024          # < 64 MiB (v7x physical), > 16/32 MiB scoped defaults
_TM, _TN, _TK = 256, 256, 512           # tile targets; fall back to full dims at small shapes


def _choose_tile(dim, target, align):
    """Largest tile <= target that is a multiple of `align` and divides `dim`;
    falls back to the full dimension (always legal per the (8,128) rule)."""
    if dim <= target:
        return dim
    t = (target // align) * align
    while t >= align:
        if dim % t == 0:
            return t
        t -= align
    return dim


# ----------------------------- matmul (tiled, fused bias + activation) -----------------------------

def _matmul_kernel(a_ref, b_ref, bias_ref, o_ref, acc_ref, *, activation):
    @pl.when(pl.program_id(2) == 0)
    def _():
        acc_ref[...] = jnp.zeros_like(acc_ref)

    acc_ref[...] += jnp.dot(a_ref[...], b_ref[...], preferred_element_type=jnp.float32)

    @pl.when(pl.program_id(2) == pl.num_programs(2) - 1)
    def _():
        out = acc_ref[...] + bias_ref[...]
        if activation == "quick_gelu":                       # CLIP QuickGELU: x*sigmoid(1.702x)
            out = out * jax.nn.sigmoid(1.702 * out)
        o_ref[...] = out.astype(o_ref.dtype)


def matmul(a, b, bias=None, activation=None):
    """a:(M,K) @ b:(K,N) (+bias, +optional QuickGELU) with fp32 accumulation."""
    M, K = a.shape
    _, N = b.shape
    if bias is None:
        bias = jnp.zeros((N,), jnp.float32)
    bias2 = bias.reshape(1, N).astype(jnp.float32)

    tm = _choose_tile(M, _TM, 8)
    tn = _choose_tile(N, _TN, 128)
    tk = _choose_tile(K, _TK, 128)
    grid = (M // tm, N // tn, K // tk)

    return pl.pallas_call(
        functools.partial(_matmul_kernel, activation=activation),
        out_shape=jax.ShapeDtypeStruct((M, N), a.dtype),
        grid=grid,
        in_specs=[pl.BlockSpec((tm, tk), lambda i, j, k: (i, k)),
                  pl.BlockSpec((tk, tn), lambda i, j, k: (k, j)),
                  pl.BlockSpec((1, tn), lambda i, j, k: (0, j))],
        out_specs=pl.BlockSpec((tm, tn), lambda i, j, k: (i, j)),
        scratch_shapes=[pltpu.VMEM((tm, tn), jnp.float32)],
        compiler_params=pltpu.CompilerParams(
            dimension_semantics=("parallel", "parallel", "arbitrary"),
            vmem_limit_bytes=_VMEM_LIMIT),
    )(a, b, bias2)


# ----------------------------- layer norm (row-tiled) -----------------------------

def _layernorm_kernel(x_ref, g_ref, b_ref, o_ref):
    x = x_ref[...].astype(jnp.float32)
    mu = jnp.mean(x, axis=-1, keepdims=True)
    var = jnp.mean((x - mu) ** 2, axis=-1, keepdims=True)
    y = (x - mu) * jax.lax.rsqrt(var + 1e-5) * g_ref[...] + b_ref[...]
    o_ref[...] = y.astype(o_ref.dtype)


def layernorm(x, gamma, beta):
    shape = x.shape
    D = shape[-1]
    x2 = x.reshape(-1, D)
    N = x2.shape[0]
    tr = _choose_tile(N, 256, 8)
    out = pl.pallas_call(
        _layernorm_kernel,
        out_shape=jax.ShapeDtypeStruct((N, D), x.dtype),
        grid=(N // tr,),
        in_specs=[pl.BlockSpec((tr, D), lambda i: (i, 0)),
                  pl.BlockSpec((1, D), lambda i: (0, 0)),
                  pl.BlockSpec((1, D), lambda i: (0, 0))],
        out_specs=pl.BlockSpec((tr, D), lambda i: (i, 0)),
        compiler_params=pltpu.CompilerParams(
            dimension_semantics=("parallel",),
            vmem_limit_bytes=_VMEM_LIMIT),
    )(x2, gamma.reshape(1, D).astype(jnp.float32), beta.reshape(1, D).astype(jnp.float32))
    return out.reshape(shape)


# ----------------------------- attention (all heads per step, lane-dense output) -----------------------------

def _attn_kernel(q_ref, k_ref, v_ref, o_ref, *, scale, causal):
    q = q_ref[0]                                             # (H, S, Dh)
    k = k_ref[0]
    v = v_ref[0]
    H, S, Dh = q.shape
    s = jnp.einsum('hqd,hkd->hqk', q, k, preferred_element_type=jnp.float32) * scale
    if causal:
        row = jax.lax.broadcasted_iota(jnp.int32, (S, S), 0)
        col = jax.lax.broadcasted_iota(jnp.int32, (S, S), 1)
        s = jnp.where((col <= row)[None], s, -jnp.inf)
    m = jnp.max(s, axis=-1, keepdims=True)
    p = jnp.exp(s - m)
    denom = jnp.sum(p, axis=-1, keepdims=True)
    p = p * pl.reciprocal(denom, approx=True)                # EUP slot, frees VALU
    o = jnp.einsum('hqk,hkd->hqd', p.astype(v.dtype), v,
                   preferred_element_type=jnp.float32)       # (H, S, Dh)
    # lane-dense write: concatenate heads along lanes -> (S, H*Dh)
    o_ref[0] = jnp.concatenate([o[h] for h in range(H)], axis=-1).astype(o_ref.dtype)


def attention(q, k, v, causal):
    """q, k, v: (B, H, S, Dh). Output: (B, S, H*Dh), heads concatenated along last dim."""
    B, H, S, Dh = q.shape
    scale = 1.0 / math.sqrt(Dh)
    D = H * Dh
    return pl.pallas_call(
        functools.partial(_attn_kernel, scale=scale, causal=causal),
        out_shape=jax.ShapeDtypeStruct((B, S, D), q.dtype),
        grid=(B,),
        in_specs=[pl.BlockSpec((1, H, S, Dh), lambda i: (i, 0, 0, 0)),
                  pl.BlockSpec((1, H, S, Dh), lambda i: (i, 0, 0, 0)),
                  pl.BlockSpec((1, H, S, Dh), lambda i: (i, 0, 0, 0))],
        out_specs=pl.BlockSpec((1, S, D), lambda i: (i, 0, 0)),
        compiler_params=pltpu.CompilerParams(
            dimension_semantics=("parallel",),
            vmem_limit_bytes=_VMEM_LIMIT),
    )(q, k, v)


# ----------------------------- depthwise conv adapters -----------------------------
# TODO(synk): taps are formed with shifted slices; at adapter sizes this is negligible and
#             the pltpu.roll variant was skipped to keep lowering simple.

def _dwconv1d_kernel(x_ref, w_ref, o_ref):
    # x: (B, L + K - 1, C) padded; w: (K, C); depthwise conv over the L axis.
    x = x_ref[...].astype(jnp.float32)
    w = w_ref[...]
    L = o_ref.shape[1]
    K = w.shape[0]
    acc = jnp.zeros(o_ref.shape, jnp.float32)
    for kk in range(K):
        acc = acc + x[:, kk:kk + L, :] * w[kk][None, None, :]
    o_ref[...] = acc.astype(o_ref.dtype)


def dwconv1d(x, w):
    # layout: x (B, L, C) channels-last; w (K, C)
    B, L, C = x.shape
    K = w.shape[0]
    pad = K // 2
    xp = jnp.pad(x, ((0, 0), (pad, pad), (0, 0)))
    Lp = L + 2 * pad
    return pl.pallas_call(
        _dwconv1d_kernel,
        out_shape=jax.ShapeDtypeStruct((B, L, C), x.dtype),
        grid=(1,),
        in_specs=[pl.BlockSpec((B, Lp, C), lambda i: (0, 0, 0)),
                  pl.BlockSpec((K, C), lambda i: (0, 0))],
        out_specs=pl.BlockSpec((B, L, C), lambda i: (0, 0, 0)),
    )(xp, w.astype(jnp.float32))


def _dwconv2d_kernel(x_ref, w_ref, o_ref, *, KH, KW):
    # x: (B, H+KH-1, W+KW-1, C) padded; w: (KH*KW, C); depthwise KHxKW.
    x = x_ref[...].astype(jnp.float32)
    w = w_ref[...]
    H, W = o_ref.shape[1], o_ref.shape[2]
    acc = jnp.zeros(o_ref.shape, jnp.float32)
    for ki in range(KH):
        for kj in range(KW):
            acc = acc + x[:, ki:ki + H, kj:kj + W, :] * w[ki * KW + kj][None, None, None, :]
    o_ref[...] = acc.astype(o_ref.dtype)


def dwconv2d(x, w):
    # layout: x NHWC (B, H, W, C); w (KH, KW, C)
    B, H, W, C = x.shape
    KH, KW = w.shape[0], w.shape[1]
    ph, pw = KH // 2, KW // 2
    xp = jnp.pad(x, ((0, 0), (ph, ph), (pw, pw), (0, 0)))
    w2 = w.reshape(KH * KW, C).astype(jnp.float32)
    return pl.pallas_call(
        functools.partial(_dwconv2d_kernel, KH=KH, KW=KW),
        out_shape=jax.ShapeDtypeStruct((B, H, W, C), x.dtype),
        grid=(1,),
        in_specs=[pl.BlockSpec((B, H + 2 * ph, W + 2 * pw, C), lambda i: (0, 0, 0, 0)),
                  pl.BlockSpec((KH * KW, C), lambda i: (0, 0))],
        out_specs=pl.BlockSpec((B, H, W, C), lambda i: (0, 0, 0, 0)),
    )(xp, w2)


# ----------------------------- L2 normalize & logits -----------------------------

def _l2norm_kernel(x_ref, o_ref):
    x = x_ref[...].astype(jnp.float32)
    inv = jax.lax.rsqrt(jnp.maximum(jnp.sum(x * x, axis=-1, keepdims=True), 1e-24))
    o_ref[...] = (x * inv).astype(o_ref.dtype)


def l2_normalize(x):
    N, D = x.shape
    return pl.pallas_call(
        _l2norm_kernel,
        out_shape=jax.ShapeDtypeStruct((N, D), x.dtype),
        grid=(1,),
        in_specs=[pl.BlockSpec((N, D), lambda i: (0, 0))],
        out_specs=pl.BlockSpec((N, D), lambda i: (0, 0)),
    )(x)


def _logits_kernel(img_ref, txt_ref, ls_ref, o_ref):
    # Fuses both F.normalize calls with the scaled matmul.
    img = img_ref[...].astype(jnp.float32)
    txt = txt_ref[...].astype(jnp.float32)
    img = img * jax.lax.rsqrt(jnp.maximum(jnp.sum(img * img, -1, keepdims=True), 1e-24))
    txt = txt * jax.lax.rsqrt(jnp.maximum(jnp.sum(txt * txt, -1, keepdims=True), 1e-24))
    o_ref[...] = jnp.exp(ls_ref[0, 0]) * jnp.dot(img, txt.T,
                                                 preferred_element_type=jnp.float32)


def clip_logits(image_features, mean_text_features, logit_scale):
    B, E = image_features.shape
    C = mean_text_features.shape[0]
    return pl.pallas_call(
        _logits_kernel,
        out_shape=jax.ShapeDtypeStruct((B, C), jnp.float32),
        grid=(1,),
        in_specs=[pl.BlockSpec((B, E), lambda i: (0, 0)),
                  pl.BlockSpec((C, E), lambda i: (0, 0)),
                  pl.BlockSpec((1, 1), lambda i: (0, 0))],
        out_specs=pl.BlockSpec((B, C), lambda i: (0, 0)),
    )(image_features, mean_text_features, logit_scale.reshape(1, 1).astype(jnp.float32))


# ----------------------------- model glue (plain JAX) -----------------------------

def text_adapted(x, conv_w, scale):
    # x: (S, B, C)  —  return_text_adapted_x: x = x + scale * DWConv1d(x)
    y = jnp.transpose(x, (1, 0, 2))                          # (B, S, C) channels-last
    y = dwconv1d(y, conv_w)
    y = jnp.transpose(y, (1, 0, 2))
    return x + scale * y


def visual_adapted(x, conv_w, scale):
    # x: (S, B, C), token 0 is CLS  —  return_visual_adapted_x (CLS untouched)
    S, B, C = x.shape
    cls_tok, rest = x[:1], x[1:]
    n = S - 1
    p = int(math.isqrt(n))
    y = jnp.transpose(rest, (1, 0, 2)).reshape(B, p, p, C)   # NHWC
    y = dwconv2d(y, conv_w)
    y = y.reshape(B, n, C).transpose(1, 0, 2)
    rest = rest + scale * y
    return jnp.concatenate([cls_tok, rest], axis=0)


def resblock(x, p, num_heads, causal, adapter, scale, adapted_fn):
    # x: (S, B, D)
    S, B, D = x.shape
    Dh = D // num_heads
    h = layernorm(x, p['ln1_g'], p['ln1_b'])
    qkv = matmul(h.reshape(S * B, D), p['attn_in_w'], p['attn_in_b'])   # fused bias
    qkv = qkv.reshape(S, B, 3, num_heads, Dh)
    q, k, v = qkv[:, :, 0], qkv[:, :, 1], qkv[:, :, 2]       # (S, B, H, Dh)

    def to_bhsd(t):
        return jnp.transpose(t, (1, 2, 0, 3))                # (B, H, S, Dh)

    o = attention(to_bhsd(q), to_bhsd(k), to_bhsd(v), causal)            # (B, S, D)
    o = jnp.transpose(o, (1, 0, 2))                                      # (S, B, D)
    o = matmul(o.reshape(S * B, D), p['attn_out_w'], p['attn_out_b']).reshape(S, B, D)
    x = x + o
    if adapter is not None:
        x = adapted_fn(x, adapter['att_conv'], scale)

    h = layernorm(x, p['ln2_g'], p['ln2_b'])
    h = matmul(h.reshape(S * B, D), p['fc_w'], p['fc_b'],
               activation="quick_gelu").reshape(S, B, 4 * D)             # fused bias + GELU
    if adapter is not None:
        h = adapted_fn(h, adapter['mlp_conv'], scale)
    h = matmul(h.reshape(S * B, 4 * D), p['proj_w'], p['proj_b'])
    return x + h.reshape(S, B, D)


def encode_text(tp, embedding, token_ids, adapters, adapter_scale):
    # TextEncoder.forward — batch dim already holds n_cls * n_temp prompts.
    x = embedding + tp['pos_emb'][None]                      # (Bt, S, D)
    x = jnp.transpose(x, (1, 0, 2))                          # (S, Bt, D)
    for li, lp in enumerate(tp['layers']):
        x = resblock(x, lp, tp['heads'], True, adapters[li], adapter_scale, text_adapted)
    x = jnp.transpose(x, (1, 0, 2))                          # (Bt, S, D)
    x = layernorm(x, tp['lnf_g'], tp['lnf_b'])
    eot = jnp.argmax(token_ids, axis=-1)                     # argmax over token ids
    pooled = x[jnp.arange(x.shape[0]), eot]                  # (Bt, D)
    return matmul(pooled, tp['text_proj'])                   # (Bt, E)


def encode_image(vp, image, adapters, adapter_scale):
    # layout: image NCHW (B, 3, H, W) like PyTorch; patch-embed conv as a matmul.
    B, C, H, W = image.shape
    P = vp['patch']
    g = H // P
    patches = image.reshape(B, C, g, P, g, P).transpose(0, 2, 4, 1, 3, 5)
    patches = patches.reshape(B * g * g, C * P * P)
    x = matmul(patches, vp['conv1_w'])                       # (B*g*g, D)
    D = x.shape[-1]
    x = x.reshape(B, g * g, D)
    cls_tok = jnp.broadcast_to(vp['cls_emb'][None, None, :], (B, 1, D))
    x = jnp.concatenate([cls_tok, x], axis=1) + vp['pos_emb'][None]
    x = layernorm(x, vp['ln_pre_g'], vp['ln_pre_b'])
    x = jnp.transpose(x, (1, 0, 2))                          # (S, B, D)
    for li, lp in enumerate(vp['layers']):
        x = resblock(x, lp, vp['heads'], False, adapters[li], adapter_scale, visual_adapted)
    x = jnp.transpose(x, (1, 0, 2))
    x = layernorm(x[:, 0, :], vp['ln_post_g'], vp['ln_post_b'])
    return matmul(x, vp['proj'])                             # (B, E)


def custom_clip_forward(params, image):
    """CustomCLIP.forward, eval-mode branch (deterministic)."""
    tk_prompts = params['tk_prompts']                        # (n_cls, n_temp, S)
    n_cls, n_temp, S = tk_prompts.shape
    adapter_scale = params['adapter_scale']

    # Fold the n_temp template loop into the batch dimension (single encoder pass).
    prompts = tk_prompts.reshape(n_cls * n_temp, S)
    embedding = params['token_emb'][prompts]                 # token_embedding (no_grad)
    tf = encode_text(params['text'], embedding, prompts,
                     params['text_adapter'], adapter_scale)  # (n_cls*n_temp, E)
    tf = l2_normalize(tf)
    mean_text_features = jnp.mean(tf.reshape(n_cls, n_temp, -1), axis=1)   # (n_cls, E)

    image_features = encode_image(params['visual'], image,
                                  params['visual_adapter'], adapter_scale)
    # Final normalize of both image features and mean text features is fused in clip_logits.
    return clip_logits(image_features, mean_text_features, params['logit_scale'])


# ----------------------------- deterministic parameter init -----------------------------

def _init_layer(key, d):
    ks = jax.random.split(key, 4)
    s = 0.02
    f32 = jnp.float32
    return dict(
        ln1_g=jnp.ones((d,), f32), ln1_b=jnp.zeros((d,), f32),
        attn_in_w=s * jax.random.normal(ks[0], (d, 3 * d), f32),
        attn_in_b=jnp.zeros((3 * d,), f32),
        attn_out_w=s * jax.random.normal(ks[1], (d, d), f32),
        attn_out_b=jnp.zeros((d,), f32),
        ln2_g=jnp.ones((d,), f32), ln2_b=jnp.zeros((d,), f32),
        fc_w=s * jax.random.normal(ks[2], (d, 4 * d), f32),
        fc_b=jnp.zeros((4 * d,), f32),
        proj_w=s * jax.random.normal(ks[3], (4 * d, d), f32),
        proj_b=jnp.zeros((d,), f32),
    )


def init_params(key):
    vocab, ctx_len = 49, 8
    d_text, text_layers, text_heads = 32, 2, 2
    d_vis, vis_layers, vis_heads = 32, 2, 2
    embed_dim, patch, res = 16, 8, 16
    n_cls, n_temp = 3, 2
    adapter_start, adapter_end = 1, 1
    s = 0.02
    f32 = jnp.float32
    keys = iter(jax.random.split(key, 64))

    text = dict(
        heads=text_heads,
        pos_emb=s * jax.random.normal(next(keys), (ctx_len, d_text), f32),
        layers=[_init_layer(next(keys), d_text) for _ in range(text_layers)],
        lnf_g=jnp.ones((d_text,), f32), lnf_b=jnp.zeros((d_text,), f32),
        text_proj=s * jax.random.normal(next(keys), (d_text, embed_dim), f32),
    )
    g = res // patch
    visual = dict(
        heads=vis_heads, patch=patch,
        conv1_w=s * jax.random.normal(next(keys), (3 * patch * patch, d_vis), f32),
        cls_emb=s * jax.random.normal(next(keys), (d_vis,), f32),
        pos_emb=s * jax.random.normal(next(keys), (g * g + 1, d_vis), f32),
        ln_pre_g=jnp.ones((d_vis,), f32), ln_pre_b=jnp.zeros((d_vis,), f32),
        layers=[_init_layer(next(keys), d_vis) for _ in range(vis_layers)],
        ln_post_g=jnp.ones((d_vis,), f32), ln_post_b=jnp.zeros((d_vis,), f32),
        proj=s * jax.random.normal(next(keys), (d_vis, embed_dim), f32),
    )

    # AdapterLearner._build_adapter: adapters only on layers [adapter_start, adapter_end]
    text_adapter = [None] * (text_layers + 1)
    visual_adapter = [None] * (vis_layers + 1)
    for i in range(adapter_start, adapter_end + 1):
        text_adapter[i] = dict(
            att_conv=s * jax.random.normal(next(keys), (3, d_text), f32),        # (K, C)
            mlp_conv=s * jax.random.normal(next(keys), (3, 4 * d_text), f32),
        )
        visual_adapter[i] = dict(
            att_conv=s * jax.random.normal(next(keys), (3, 3, d_vis), f32),      # (KH, KW, C)
            mlp_conv=s * jax.random.normal(next(keys), (3, 3, 4 * d_vis), f32),
        )

    tk_prompts = jax.random.randint(next(keys), (n_cls, n_temp, ctx_len), 1, vocab,
                                    dtype=jnp.int32)

    return dict(
        token_emb=s * jax.random.normal(next(keys), (vocab, d_text), f32),
        tk_prompts=tk_prompts,
        text=text, visual=visual,
        text_adapter=text_adapter, visual_adapter=visual_adapter,
        adapter_scale=0.1,                                   # cfg.TRAINER.LWEIB.ADAPTER_SCALE
        logit_scale=jnp.array(math.log(1.0 / 0.07), f32),    # clip_model.logit_scale
    )


if __name__ == "__main__":
    key = jax.random.PRNGKey(0)
    params = init_params(key)
    image = jax.random.normal(jax.random.fold_in(key, 123), (2, 3, 16, 16), jnp.float32)  # NCHW
    logits = custom_clip_forward(params, image)
    logits = jax.block_until_ready(logits)
    assert logits.shape == (2, 3) and bool(jnp.all(jnp.isfinite(logits)))
    print("KERNEL_OK")
</pallas_src>

<mosaic_0001>
module attributes {stable_mosaic.version = 11 : i64} {
  func.func @_layernorm_kernel(%arg0: i32, %arg1: memref<48x32xf32, #tpu.memory_space<vmem>>, %arg2: memref<1x32xf32, #tpu.memory_space<vmem>>, %arg3: memref<1x32xf32, #tpu.memory_space<vmem>>, %arg4: memref<48x32xf32, #tpu.memory_space<vmem>>) attributes {dimension_semantics = [#tpu.dimension_semantics<parallel>], iteration_bounds = array<i64: 1>, scalar_prefetch = 0 : i64, scratch_operands = 0 : i64, tpu.core_type = #tpu.core_type<tc>, window_params = [{transform_indices = @transform_0, window_bounds = array<i64: 48, 32>}, {pipeline_mode = #tpu.pipeline_mode<synchronous>, transform_indices = @transform_1, window_bounds = array<i64: 1, 32>}, {pipeline_mode = #tpu.pipeline_mode<synchronous>, transform_indices = @transform_2, window_bounds = array<i64: 1, 32>}, {transform_indices = @transform_3, window_bounds = array<i64: 48, 32>}]} {
    %c0 = arith.constant 0 : index
    %c0_0 = arith.constant 0 : index
    %0 = vector.load %arg1[%c0, %c0_0] : memref<48x32xf32, #tpu.memory_space<vmem>>, vector<48x32xf32>
    %cst = arith.constant dense<0.000000e+00> : vector<48xf32>
    %1 = vector.multi_reduction <add>, %0, %cst [1] : vector<48x32xf32> to vector<48xf32>
    %2 = vector.shape_cast %1 : vector<48xf32> to vector<48x1xf32>
    %cst_1 = arith.constant 3.200000e+01 : f32
    %3 = vector.broadcast %cst_1 : f32 to vector<48x1xf32>
    %4 = arith.divf %2, %3 : vector<48x1xf32>
    %5 = vector.broadcast %4 : vector<48x1xf32> to vector<48x32xf32>
    %6 = arith.subf %0, %5 : vector<48x32xf32>
    %7 = arith.mulf %6, %6 : vector<48x32xf32>
    %cst_2 = arith.constant dense<0.000000e+00> : vector<48xf32>
    %8 = vector.multi_reduction <add>, %7, %cst_2 [1] : vector<48x32xf32> to vector<48xf32>
    %9 = vector.shape_cast %8 : vector<48xf32> to vector<48x1xf32>
    %cst_3 = arith.constant 3.200000e+01 : f32
    %10 = vector.broadcast %cst_3 : f32 to vector<48x1xf32>
    %11 = arith.divf %9, %10 : vector<48x1xf32>
    %12 = vector.broadcast %4 : vector<48x1xf32> to vector<48x32xf32>
    %13 = arith.subf %0, %12 : vector<48x32xf32>
    %cst_4 = arith.constant 9.99999974E-6 : f32
    %14 = vector.broadcast %cst_4 : f32 to vector<48x1xf32>
    %15 = arith.addf %11, %14 : vector<48x1xf32>
    %16 = math.rsqrt %15 : vector<48x1xf32>
    %17 = vector.broadcast %16 : vector<48x1xf32> to vector<48x32xf32>
    %18 = arith.mulf %13, %17 : vector<48x32xf32>
    %c0_5 = arith.constant 0 : index
    %c0_6 = arith.constant 0 : index
    %19 = vector.load %arg2[%c0_5, %c0_6] : memref<1x32xf32, #tpu.memory_space<vmem>>, vector<1x32xf32>
    %20 = vector.broadcast %19 : vector<1x32xf32> to vector<48x32xf32>
    %21 = arith.mulf %18, %20 : vector<48x32xf32>
    %c0_7 = arith.constant 0 : index
    %c0_8 = arith.constant 0 : index
    %22 = vector.load %arg3[%c0_7, %c0_8] : memref<1x32xf32, #tpu.memory_space<vmem>>, vector<1x32xf32>
    %23 = vector.broadcast %22 : vector<1x32xf32> to vector<48x32xf32>
    %24 = arith.addf %21, %23 : vector<48x32xf32>
    %c0_9 = arith.constant 0 : index
    %c0_10 = arith.constant 0 : index
    %25 = vector.load %arg4[%c0_9, %c0_10] : memref<48x32xf32, #tpu.memory_space<vmem>>, vector<48x32xf32>
    tpu.vector_store %arg4[%c0_9, %c0_10], %24 {strides = array<i32>} : memref<48x32xf32, #tpu.memory_space<vmem>>, vector<48x32xf32>,
    return
  }
  func.func @transform_0(%arg0: i32) -> (i32, i32) {
    %c0_i32 = arith.constant 0 : i32
    %c0_i32_0 = arith.constant 0 : i32
    return %arg0, %c0_i32 : i32, i32
  }
  func.func @transform_1(%arg0: i32) -> (i32, i32) {
    %c0_i32 = arith.constant 0 : i32
    %c0_i32_0 = arith.constant 0 : i32
    %c0_i32_1 = arith.constant 0 : i32
    return %c0_i32, %c0_i32_0 : i32, i32
  }
  func.func @transform_2(%arg0: i32) -> (i32, i32) {
    %c0_i32 = arith.constant 0 : i32
    %c0_i32_0 = arith.constant 0 : i32
    %c0_i32_1 = arith.constant 0 : i32
    return %c0_i32, %c0_i32_0 : i32, i32
  }
  func.func @transform_3(%arg0: i32) -> (i32, i32) {
    %c0_i32 = arith.constant 0 : i32
    %c0_i32_0 = arith.constant 0 : i32
    return %arg0, %c0_i32 : i32, i32
  }
}

</mosaic_0001>

<bundles_post_ra>
// kernel: tpu_custom_call.1
= control target key start
LH: loop header
LB: loop body
LE: loop exit
PB: predicated region body
PF: predicated region fallthrough
CT: control target
= control target key end

     0   :  { %vm20_vm0 = vcmask 261120   ;;  %s245_s0 = inlined_call_operand.vmem [shape: f32[48,32], index: 0, kind: input, shape index: {}]   ;;  %s246_s1 = inlined_call_operand.vmem [shape: f32[1,32], index: 1, kind: input, shape index: {}]   ;;  %s247_s2 = inlined_call_operand.vmem [shape: f32[1,32], index: 2, kind: input, shape index: {}]   ;;  %s248_s3 = inlined_call_operand.vmem [shape: f32[48,32], index: 3, kind: output, shape index: {}]  }
   0x1   :  { %v14_v0 = vld [vmem:[%s245_s0] sm:$0xff]  ;;  %v16_v1 = vld [vmem:[%s245_s0 + $0x10] sm:$0xff]  ;;  %v15_v2 = vld [vmem:[%s245_s0 + $0x8] sm:$0xff] }
   0x2   :  { %v21_v3 = vsel %vm20_vm0, %v14_v0, 0.0  ;;  %v27_v4 = vsel %vm20_vm0, %v16_v1, 0.0  ;;  %v17_v5 = vld [vmem:[%s245_s0 + $0x18] sm:$0xff]  ;;  %v24_v6 = vsel %vm20_vm0, %v15_v2, 0.0  ;;  %v18_v8 = vld [vmem:[%s245_s0 + $0x20] sm:$0xff]  ;;  %v19_v9 = vld [vmem:[%s245_s0 + $0x28] sm:$0xff] }
   0x3   :  { %22 = vadd.xlane.f32.xlu0 %v21_v3  ;;  %28 = vadd.xlane.f32.xlu1 %v27_v4  ;;  %v30_v7 = vsel %vm20_vm0, %v17_v5, 0.0  ;;  %v33_v10 = vsel %vm20_vm0, %v18_v8, 0.0  ;;  %v36_v11 = vsel %vm20_vm0, %v19_v9, 0.0  ;;  %v136_v61 = vld [vmem:[%s246_s1] ss:$0 sm:$0xff] }
   0x4   :  { %v137_v63 = vld [vmem:[%s247_s2] ss:$0 sm:$0xff] }
   0x7   :  { %25 = vadd.xlane.f32.xlu0 %v24_v6  ;;  %31 = vadd.xlane.f32.xlu1 %v30_v7 }
   0xb   :  { %34 = vadd.xlane.f32.xlu0 %v33_v10  ;;  %37 = vadd.xlane.f32.xlu1 %v36_v11 }
  0x8c   :  { %v23_v12 = vpop.xlane.xlu0 %22  ;;  %v29_v13 = vpop.xlane.xlu1 %28 }
  0x8d   :  { %v40_v14 = vmul.f32 0.03125, %v23_v12  ;;  %v42_v15 = vmul.f32 0.03125, %v29_v13 }
  0x8f   :  { %v46_v16 = vsub.f32 %v14_v0, %v40_v14  ;;  %v194_v17 = vsub.f32 %v16_v1, %v42_v15 }
  0x90   :  { %v26_v18 = vpop.xlane.xlu0 %25  ;;  %v32_v19 = vpop.xlane.xlu1 %31 }
  0x91   :  { %v41_v20 = vmul.f32 0.03125, %v26_v18  ;;  %v43_v21 = vmul.f32 0.03125, %v32_v19  ;;  %v52_v22 = vmul.f32 %v46_v16, %v46_v16  ;;  %v54_v23 = vmul.f32 %v194_v17, %v194_v17 }
  0x93   :  { %v47_v24 = vsub.f32 %v15_v2, %v41_v20  ;;  %v198_v25 = vsub.f32 %v17_v5, %v43_v21  ;;  %v58_v26 = vsel %vm20_vm0, %v52_v22, 0.0  ;;  %v64_v29 = vsel %vm20_vm0, %v54_v23, 0.0 }
  0x94   :  { %59 = vadd.xlane.f32.xlu0 %v58_v26  ;;  %v35_v27 = vpop.xlane.xlu0 %34  ;;  %v38_v28 = vpop.xlane.xlu1 %37 }
  0x95   :  { %v44_v30 = vmul.f32 0.03125, %v35_v27  ;;  %v45_v31 = vmul.f32 0.03125, %v38_v28  ;;  %v53_v32 = vmul.f32 %v47_v24, %v47_v24  ;;  %v55_v33 = vmul.f32 %v198_v25, %v198_v25 }
  0x97   :  { %v50_v34 = vsub.f32 %v18_v8, %v44_v30  ;;  %v204_v35 = vsub.f32 %v19_v9, %v45_v31  ;;  %v61_v36 = vsel %vm20_vm0, %v53_v32, 0.0  ;;  %v67_v37 = vsel %vm20_vm0, %v55_v33, 0.0 }
  0x98   :  { %65 = vadd.xlane.f32.xlu0 %v64_v29  ;;  %62 = vadd.xlane.f32.xlu1 %v61_v36 }
  0x99   :  { %v56_v38 = vmul.f32 %v50_v34, %v50_v34  ;;  %v57_v39 = vmul.f32 %v204_v35, %v204_v35 }
  0x9b   :  { %v70_v40 = vsel %vm20_vm0, %v56_v38, 0.0  ;;  %v73_v41 = vsel %vm20_vm0, %v57_v39, 0.0 }
  0x9c   :  { %68 = vadd.xlane.f32.xlu1 %v67_v37  ;;  %71 = vadd.xlane.f32.xlu0 %v70_v40 }
  0xa0   :  { %74 = vadd.xlane.f32.xlu1 %v73_v41 }
 0x11d   :  { %v60_v42 = vpop.xlane.xlu0 %59 }
 0x11e   :  { %v76_v43 = vmul.f32 0.03125, %v60_v42 }
 0x120   :  { %v82_v44 = vadd.f32 1e-05, %v76_v43 }
 0x121   :  { %v63_v45 = vpop.xlane.xlu1 %62  ;;  %v66_v46 = vpop.xlane.xlu0 %65 }
 0x122   :  { %138 = vrsqrt.f32 %v82_v44  ;;  %v77_v47 = vmul.f32 0.03125, %v63_v45  ;;  %v78_v48 = vmul.f32 0.03125, %v66_v46 }
 0x124   :  { %v83_v49 = vadd.f32 1e-05, %v77_v47  ;;  %v84_v50 = vadd.f32 1e-05, %v78_v48 }
 0x125   :  { %v69_v51 = vpop.xlane.xlu1 %68  ;;  %v72_v52 = vpop.xlane.xlu0 %71 }
 0x126   :  { %140 = vrsqrt.f32 %v83_v49  ;;  %v79_v53 = vmul.f32 0.03125, %v69_v51  ;;  %v80_v54 = vmul.f32 0.03125, %v72_v52 }
 0x127   :  { %142 = vrsqrt.f32 %v84_v50 }
 0x128   :  { %v85_v55 = vadd.f32 1e-05, %v79_v53  ;;  %v86_v56 = vadd.f32 1e-05, %v80_v54 }
 0x129   :  { %v75_v57 = vpop.xlane.xlu1 %74 }
 0x12a   :  { %144 = vrsqrt.f32 %v85_v55  ;;  %v81_v58 = vmul.f32 0.03125, %v75_v57 }
 0x12b   :  { %146 = vrsqrt.f32 %v86_v56 }
 0x12c   :  { %v87_v59 = vadd.f32 1e-05, %v81_v58 }
 0x12e   :  { %148 = vrsqrt.f32 %v87_v59 }
 0x12f   :  { %v139_v60 = vpop.eup %138 }
 0x130   :  { %v94_v62 = vmul.f32 %v139_v60, %v46_v16 }
 0x132   :  { %v107_v0 = vmul.f32 %v136_v61, %v94_v62 }
 0x133   :  { %v141_v1 = vpop.eup %140 }
 0x134   :  { %v143_v2 = vpop.eup %142  ;;  %v120_v3 = vadd.f32 %v137_v63, %v107_v0  ;;  %v95_v4 = vmul.f32 %v141_v1, %v47_v24 }
 0x135   :  { %v96_v5 = vmul.f32 %v143_v2, %v194_v17 }
 0x136   :  { %126 = vst.msk [vmem:[%s248_s3] sm:$0xff] %vm20_vm0, %v120_v3  ;;  %v108_v6 = vmul.f32 %v136_v61, %v95_v4 }
 0x137   :  { %v145_v7 = vpop.eup %144  ;;  %v109_v8 = vmul.f32 %v136_v61, %v96_v5 }
 0x138   :  { %v147_v9 = vpop.eup %146  ;;  %v121_v10 = vadd.f32 %v137_v63, %v108_v6  ;;  %v97_v11 = vmul.f32 %v145_v7, %v198_v25 }
 0x139   :  { %v122_v12 = vadd.f32 %v137_v63, %v109_v8  ;;  %v98_v13 = vmul.f32 %v147_v9, %v50_v34 }
 0x13a   :  { %127 = vst.msk [vmem:[%s248_s3 + $0x8] sm:$0xff] %vm20_vm0, %v121_v10  ;;  %v110_v14 = vmul.f32 %v136_v61, %v97_v11 }
 0x13b   :  { %v149_v15 = vpop.eup %148  ;;  %128 = vst.msk [vmem:[%s248_s3 + $0x10] sm:$0xff] %vm20_vm0, %v122_v12  ;;  %v111_v16 = vmul.f32 %v136_v61, %v98_v13 }
 0x13c   :  { %v123_v17 = vadd.f32 %v137_v63, %v110_v14  ;;  %v99_v18 = vmul.f32 %v149_v15, %v204_v35 }
 0x13d   :  { %v124_v19 = vadd.f32 %v137_v63, %v111_v16 }
 0x13e   :  { %129 = vst.msk [vmem:[%s248_s3 + $0x18] sm:$0xff] %vm20_vm0, %v123_v17  ;;  %v112_v20 = vmul.f32 %v136_v61, %v99_v18 }
 0x13f   :  { %130 = vst.msk [vmem:[%s248_s3 + $0x20] sm:$0xff] %vm20_vm0, %v124_v19 }
 0x140   :  { %v125_v21 = vadd.f32 %v137_v63, %v112_v20 }
 0x142   :  { %131 = vst.msk [vmem:[%s248_s3 + $0x28] sm:$0xff] %vm20_vm0, %v125_v21 }

</bundles_post_ra>
